<compile_context>
chip_gen: v6e
topology: v6e:2x2x1
jax: 0.10.0
libtpu: 0.0.40
codegen_flags: <defaults>
</compile_context>

<pallas_src>
import jax
import jax.numpy as jnp
from jax import lax
from jax.experimental import pallas as pl
from jax.experimental.pallas import tpu as pltpu


def _round_up(x, m):
    return x + ((-x) % m)


def _critic_kernel(x_ref, w1_ref, b1_ref, w2_ref, b2_ref, w3_ref, b3_ref, o_ref):
    x = x_ref[...]                                                   # (TB, D) f32

    # fc1: f32 MXU matmul (HIGHEST precision -- free here, kernel is overhead bound).
    h1 = jnp.dot(x, w1_ref[...], preferred_element_type=jnp.float32,
                 precision=lax.Precision.HIGHEST) + b1_ref[...]
    h1 = jnp.maximum(h1, 0.0)                                        # (TB, 128)

    # fc2: same recipe.
    h2 = jnp.dot(h1, w2_ref[...], preferred_element_type=jnp.float32,
                 precision=lax.Precision.HIGHEST) + b2_ref[...]
    h2 = jnp.maximum(h2, 0.0)                                        # (TB, 64)

    # fc3 has a single output feature. Computing it as w3_row @ h2^T (same
    # contraction pattern as attention's Q@K^T, so no transpose is materialized)
    # makes the MXU emit the value row directly in a lane-dense (1, TB) layout:
    # the writeback is an unmasked, lane-major store instead of TB/8 masked
    # (TB, 1) partial stores, and no in-kernel relayout is needed.
    v = lax.dot_general(w3_ref[...], h2,
                        dimension_numbers=(((1,), (1,)), ((), ())),
                        preferred_element_type=jnp.float32,
                        precision=lax.Precision.HIGHEST)             # (1, TB)
    o_ref[...] = v + b3_ref[...]                                     # (1, TB)


def critic_forward(state, params, *, tb_max=1024):
    """state: (B, state_dim) float32 -> value: (B, 1) float32."""
    w1, b1, w2, b2, w3, b3 = params
    B, D = state.shape
    H1 = w1.shape[1]
    H2 = w2.shape[1]

    # Pad the batch only up to the next sublane multiple of 8 (at most 7 rows);
    # the ragged last tile is left to Pallas (no full-input jnp.pad copy in HBM).
    B8 = _round_up(B, 8)
    if B8 != B:
        state = jnp.pad(state, ((0, B8 - B), (0, 0)))

    if B8 <= 512:
        # Small batch: one tile, avoid per-grid-step overhead.
        TB = B8
    else:
        # Mid/large batch: at least 2 tiles so the "parallel" batch axis shards
        # across v7x's two TensorCores; tile is a multiple of 128 so the
        # lane-dense output blocks stay unmasked. Capped at tb_max (sweepable).
        TB = min(tb_max, _round_up(pl.cdiv(B8, 2), 128))
    num_tiles = pl.cdiv(B8, TB)

    w3_row = w3.T  # (1, H2): row layout so fc3 is the Q@K^T-style contraction.

    # Streamed x operand: deeper pipelining only pays off with enough tiles.
    x_spec_kwargs = {}
    if num_tiles >= 4:
        x_spec_kwargs = dict(pipeline_mode=pl.Buffered(3))
    x_spec = pl.BlockSpec((TB, D), lambda i: (i, 0), **x_spec_kwargs)

    flops = 2 * B * (D * H1 + H1 * H2 + H2)
    bytes_accessed = 4 * (B * D + B
                          + w1.size + b1.size + w2.size + b2.size
                          + w3.size + b3.size)

    out = pl.pallas_call(
        _critic_kernel,
        out_shape=jax.ShapeDtypeStruct((1, num_tiles * TB), jnp.float32),
        grid=(num_tiles,),
        in_specs=[
            # x: one batch tile per grid step (pipelined; last tile may be ragged).
            x_spec,
            # weights / biases: whole array, constant block index -> VMEM-resident.
            pl.BlockSpec(w1.shape, lambda i: (0, 0)),
            pl.BlockSpec(b1.shape, lambda i: (0, 0)),
            pl.BlockSpec(w2.shape, lambda i: (0, 0)),
            pl.BlockSpec(b2.shape, lambda i: (0, 0)),
            pl.BlockSpec(w3_row.shape, lambda i: (0, 0)),
            pl.BlockSpec(b3.shape, lambda i: (0, 0)),
        ],
        # Lane-dense output: one (1, TB) row per tile.
        out_specs=pl.BlockSpec((1, TB), lambda i: (0, i)),
        compiler_params=pltpu.CompilerParams(
            dimension_semantics=("parallel",)),
        cost_estimate=pl.CostEstimate(
            flops=flops, transcendentals=0, bytes_accessed=bytes_accessed),
    )(state, w1, b1, w2, b2, w3_row, b3)

    # Undo the lane-dense layout plumbing in the wrapper.
    return out[0, :B].reshape(B, 1)


def init_params(key, state_dim):
    """Deterministic init matching the PyTorch module's shapes.

    Weights kept as (in, out) so the kernel does x @ W; biases as (1, out)
    for clean 2-D broadcasting in VMEM.
    """
    k1, k2, k3, k4, k5, k6 = jax.random.split(key, 6)

    def lin(kw, kb, fan_in, fan_out):
        bound = 1.0 / jnp.sqrt(fan_in)
        w = jax.random.uniform(kw, (fan_in, fan_out), jnp.float32, -bound, bound)
        b = jax.random.uniform(kb, (1, fan_out), jnp.float32, -bound, bound)
        return w, b

    w1, b1 = lin(k1, k2, state_dim, 128)
    w2, b2 = lin(k3, k4, 128, 64)
    w3, b3 = lin(k5, k6, 64, 1)
    return (w1, b1, w2, b2, w3, b3)


def critic_reference(state, params):
    w1, b1, w2, b2, w3, b3 = params
    h1 = jnp.maximum(state @ w1 + b1, 0.0)
    h2 = jnp.maximum(h1 @ w2 + b2, 0.0)
    return h2 @ w3 + b3


if __name__ == "__main__":
    key = jax.random.PRNGKey(0)
    k_state, k_params = jax.random.split(key)

    batch, state_dim = 8, 32
    state = jax.random.normal(k_state, (batch, state_dim), jnp.float32)
    params = init_params(k_params, state_dim)

    value = critic_forward(state, params)
    value = jax.block_until_ready(value)

    ref = critic_reference(state, params)
    assert value.shape == (batch, 1)
    # f32 matmuls at HIGHEST precision -> tight parity with the f32 reference;
    # tolerance left modestly loose to be robust to MXU pass decomposition.
    assert jnp.allclose(value, ref, atol=1e-2, rtol=1e-2), "mismatch vs reference"

    print("KERNEL_OK")
</pallas_src>

<mosaic_0001>
module attributes {stable_mosaic.version = 11 : i64} {
  func.func @_critic_kernel(%arg0: i32, %arg1: memref<8x32xf32, #tpu.memory_space<vmem>>, %arg2: memref<32x128xf32, #tpu.memory_space<vmem>>, %arg3: memref<1x128xf32, #tpu.memory_space<vmem>>, %arg4: memref<128x64xf32, #tpu.memory_space<vmem>>, %arg5: memref<1x64xf32, #tpu.memory_space<vmem>>, %arg6: memref<1x64xf32, #tpu.memory_space<vmem>>, %arg7: memref<1x1xf32, #tpu.memory_space<vmem>>, %arg8: memref<1x8xf32, #tpu.memory_space<vmem>>) attributes {dimension_semantics = [#tpu.dimension_semantics<parallel>], iteration_bounds = array<i64: 1>, scalar_prefetch = 0 : i64, scratch_operands = 0 : i64, tpu.core_type = #tpu.core_type<tc>, window_params = [{transform_indices = @transform_0, window_bounds = array<i64: 8, 32>}, {pipeline_mode = #tpu.pipeline_mode<synchronous>, transform_indices = @transform_1, window_bounds = array<i64: 32, 128>}, {pipeline_mode = #tpu.pipeline_mode<synchronous>, transform_indices = @transform_2, window_bounds = array<i64: 1, 128>}, {pipeline_mode = #tpu.pipeline_mode<synchronous>, transform_indices = @transform_3, window_bounds = array<i64: 128, 64>}, {pipeline_mode = #tpu.pipeline_mode<synchronous>, transform_indices = @transform_4, window_bounds = array<i64: 1, 64>}, {pipeline_mode = #tpu.pipeline_mode<synchronous>, transform_indices = @transform_5, window_bounds = array<i64: 1, 64>}, {pipeline_mode = #tpu.pipeline_mode<synchronous>, transform_indices = @transform_6, window_bounds = array<i64: 1, 1>}, {transform_indices = @transform_7, window_bounds = array<i64: 1, 8>}]} {
    %c0 = arith.constant 0 : index
    %c0_0 = arith.constant 0 : index
    %0 = vector.load %arg1[%c0, %c0_0] : memref<8x32xf32, #tpu.memory_space<vmem>>, vector<8x32xf32>
    %c0_1 = arith.constant 0 : index
    %c0_2 = arith.constant 0 : index
    %1 = vector.load %arg2[%c0_1, %c0_2] : memref<32x128xf32, #tpu.memory_space<vmem>>, vector<32x128xf32>
    %cst = arith.constant dense<0.000000e+00> : vector<8x128xf32>
    %2 = tpu.matmul %0, %1, %cst {dimension_numbers = #tpu.dot_dimension_numbers<[1], [0], [0], [1], [0, 0, 1, 1], [], []>, precision = #tpu.contract_precision<fp32>} : vector<8x32xf32>, vector<32x128xf32>, vector<8x128xf32> -> vector<8x128xf32>
    %c0_3 = arith.constant 0 : index
    %c0_4 = arith.constant 0 : index
    %3 = vector.load %arg3[%c0_3, %c0_4] : memref<1x128xf32, #tpu.memory_space<vmem>>, vector<1x128xf32>
    %4 = vector.broadcast %3 : vector<1x128xf32> to vector<8x128xf32>
    %5 = arith.addf %2, %4 : vector<8x128xf32>
    %cst_5 = arith.constant 0.000000e+00 : f32
    %6 = vector.broadcast %cst_5 : f32 to vector<8x128xf32>
    %7 = arith.maximumf %5, %6 : vector<8x128xf32>
    %c0_6 = arith.constant 0 : index
    %c0_7 = arith.constant 0 : index
    %8 = vector.load %arg4[%c0_6, %c0_7] : memref<128x64xf32, #tpu.memory_space<vmem>>, vector<128x64xf32>
    %cst_8 = arith.constant dense<0.000000e+00> : vector<8x64xf32>
    %9 = tpu.matmul %7, %8, %cst_8 {dimension_numbers = #tpu.dot_dimension_numbers<[1], [0], [0], [1], [0, 0, 1, 1], [], []>, precision = #tpu.contract_precision<fp32>} : vector<8x128xf32>, vector<128x64xf32>, vector<8x64xf32> -> vector<8x64xf32>
    %c0_9 = arith.constant 0 : index
    %c0_10 = arith.constant 0 : index
    %10 = vector.load %arg5[%c0_9, %c0_10] : memref<1x64xf32, #tpu.memory_space<vmem>>, vector<1x64xf32>
    %11 = vector.broadcast %10 : vector<1x64xf32> to vector<8x64xf32>
    %12 = arith.addf %9, %11 : vector<8x64xf32>
    %cst_11 = arith.constant 0.000000e+00 : f32
    %13 = vector.broadcast %cst_11 : f32 to vector<8x64xf32>
    %14 = arith.maximumf %12, %13 : vector<8x64xf32>
    %c0_12 = arith.constant 0 : index
    %c0_13 = arith.constant 0 : index
    %15 = vector.load %arg6[%c0_12, %c0_13] : memref<1x64xf32, #tpu.memory_space<vmem>>, vector<1x64xf32>
    %cst_14 = arith.constant dense<0.000000e+00> : vector<1x8xf32>
    %16 = tpu.matmul %15, %14, %cst_14 {dimension_numbers = #tpu.dot_dimension_numbers<[1], [1], [0], [0], [0, 0, 1, 0], [], []>, precision = #tpu.contract_precision<fp32>} : vector<1x64xf32>, vector<8x64xf32>, vector<1x8xf32> -> vector<1x8xf32>
    %c0_15 = arith.constant 0 : index
    %c0_16 = arith.constant 0 : index
    %17 = vector.load %arg7[%c0_15, %c0_16] : memref<1x1xf32, #tpu.memory_space<vmem>>, vector<1x1xf32>
    %18 = vector.broadcast %17 : vector<1x1xf32> to vector<1x8xf32>
    %19 = arith.addf %16, %18 : vector<1x8xf32>
    %c0_17 = arith.constant 0 : index
    %c0_18 = arith.constant 0 : index
    %20 = vector.load %arg8[%c0_17, %c0_18] : memref<1x8xf32, #tpu.memory_space<vmem>>, vector<1x8xf32>
    tpu.vector_store %arg8[%c0_17, %c0_18], %19 {strides = array<i32>} : memref<1x8xf32, #tpu.memory_space<vmem>>, vector<1x8xf32>,
    return
  }
  func.func @transform_0(%arg0: i32) -> (i32, i32) {
    %c0_i32 = arith.constant 0 : i32
    %c0_i32_0 = arith.constant 0 : i32
    return %arg0, %c0_i32 : i32, i32
  }
  func.func @transform_1(%arg0: i32) -> (i32, i32) {
    %c0_i32 = arith.constant 0 : i32
    %c0_i32_0 = arith.constant 0 : i32
    %c0_i32_1 = arith.constant 0 : i32
    return %c0_i32, %c0_i32_0 : i32, i32
  }
  func.func @transform_2(%arg0: i32) -> (i32, i32) {
    %c0_i32 = arith.constant 0 : i32
    %c0_i32_0 = arith.constant 0 : i32
    %c0_i32_1 = arith.constant 0 : i32
    return %c0_i32, %c0_i32_0 : i32, i32
  }
  func.func @transform_3(%arg0: i32) -> (i32, i32) {
    %c0_i32 = arith.constant 0 : i32
    %c0_i32_0 = arith.constant 0 : i32
    %c0_i32_1 = arith.constant 0 : i32
    return %c0_i32, %c0_i32_0 : i32, i32
  }
  func.func @transform_4(%arg0: i32) -> (i32, i32) {
    %c0_i32 = arith.constant 0 : i32
    %c0_i32_0 = arith.constant 0 : i32
    %c0_i32_1 = arith.constant 0 : i32
    return %c0_i32, %c0_i32_0 : i32, i32
  }
  func.func @transform_5(%arg0: i32) -> (i32, i32) {
    %c0_i32 = arith.constant 0 : i32
    %c0_i32_0 = arith.constant 0 : i32
    %c0_i32_1 = arith.constant 0 : i32
    return %c0_i32, %c0_i32_0 : i32, i32
  }
  func.func @transform_6(%arg0: i32) -> (i32, i32) {
    %c0_i32 = arith.constant 0 : i32
    %c0_i32_0 = arith.constant 0 : i32
    %c0_i32_1 = arith.constant 0 : i32
    return %c0_i32, %c0_i32_0 : i32, i32
  }
  func.func @transform_7(%arg0: i32) -> (i32, i32) {
    %c0_i32 = arith.constant 0 : i32
    %c0_i32_0 = arith.constant 0 : i32
    return %c0_i32, %arg0 : i32, i32
  }
}

</mosaic_0001>

<bundles_post_ra>
// kernel: tpu_custom_call.1
= control target key start
LH: loop header
LB: loop body
LE: loop exit
PB: predicated region body
PF: predicated region fallthrough
CT: control target
= control target key end

     0   :  { %s2737_s0 = inlined_call_operand.vmem [shape: f32[8,32], index: 0, kind: input, shape index: {}]   ;;  %s2738_s1 = inlined_call_operand.vmem [shape: f32[32,128], index: 1, kind: input, shape index: {}]   ;;  %s2739_s2 = inlined_call_operand.vmem [shape: f32[1,128], index: 2, kind: input, shape index: {}]   ;;  %s2740_s3 = inlined_call_operand.vmem [shape: f32[128,64], index: 3, kind: input, shape index: {}]   ;;  %s2741_s4 = inlined_call_operand.vmem [shape: f32[1,64], index: 4, kind: input, shape index: {}]   ;;  %s2742_s5 = inlined_call_operand.vmem [shape: f32[1,64], index: 5, kind: input, shape index: {}]   ;;  %s2743_s6 = inlined_call_operand.<no memory space> [shape: f32[1,1], index: 6, kind: input, shape index: {}]   ;;  %s2744_s7 = inlined_call_operand.hbm [shape: f32[1,8], index: 7, kind: output, shape index: {}]  }
   0x1   :  { %v12_v0 = vstv %s2743_s6 }
   0x2   :  { %13 = vst [vmem:[#allocation2] sm:$0x1] %v12_v0 }
   0x3   :  { %v33_v1 = vld [vmem:[%s2738_s1 + $0x18] sm:$0xff]  ;;  %v32_v2 = vld [vmem:[%s2738_s1 + $0x10] sm:$0xff]  ;;  %v31_v3 = vld [vmem:[%s2738_s1 + $0x8] sm:$0xff]  ;;  %vm41_vm0 = vcmask 261120   ;;  %v2155_v4 = vmov 0.0   ;;  %vm2156_vm1 = vmmov 0  }
   0x4   :  { %1822 = vmatprep.subr.mxu0 %v2155_v4  ;;  %v2212_v5 = vand.u32 4294901760, %v33_v1  ;;  %v2214_v6 = vand.u32 4294901760, %v32_v2  ;;  %v2216_v7 = vand.u32 4294901760, %v31_v3  ;;  %1833 = vmatprep.subr.mxu1 %v2155_v4  ;;  %v30_v8 = vld [vmem:[%s2738_s1] sm:$0xff] }
   0x5   :  { %v29_v9 = vld [vmem:[%s2737_s0] sm:$0xff]  ;;  %v2225_v10 = vand.u32 4294901760, %v30_v8  ;;  %1830 = vmatprep.mubr.msk.f32.mxu0 %vm2156_vm1, %v2155_v4  ;;  %1841 = vmatprep.mubr.msk.f32.mxu1 %vm2156_vm1, %v2155_v4 }
   0x6   :  { %v43_v11 = vsel %vm41_vm0, %v29_v9, 0  ;;  %1823 = vmatpush3.msra.mxu0 %v2212_v5  ;;  %v150_v12 = vsub.f32 %v33_v1, %v2212_v5  ;;  %v157_v14 = vsub.f32 %v32_v2, %v2214_v6  ;;  %v2237_v15 = vsub.f32 %v31_v3, %v2216_v7 }
   0x7   :  { %v2233_v13 = vand.u32 4294901760, %v43_v11 }
   0x8   :  { %14 = vsyncpa [#allocation4], 0  ;;  %1824 = vmatprep.subr.mxu0 %v2155_v4  ;;  %v2241_v16 = vsub.f32 %v30_v8, %v2225_v10  ;;  %v151_v17 = vand.u32 4294901760, %v150_v12  ;;  %v158_v19 = vand.u32 4294901760, %v157_v14  ;;  %v165_v20 = vand.u32 4294901760, %v2237_v15  ;;  %v546_v33 = vld [vmem:[%s2740_s3 + $0x78] sm:$0xff] }
   0x9   :  { %1825 = vmatpush3.msra.mxu0 %v2214_v6  ;;  %v2245_v18 = vsub.f32 %v43_v11, %v2233_v13  ;;  %v545_v34 = vld [vmem:[%s2740_s3 + $0x70] sm:$0xff]  ;;  %v2273_v35 = vand.u32 4294901760, %v546_v33  ;;  %v544_v36 = vld [vmem:[%s2740_s3 + $0x68] sm:$0xff]  ;;  %v543_v51 = vld [vmem:[%s2740_s3 + $0x60] sm:$0xff]  ;;  %vm1207_vm2 = vcmask 523264   ;;  %vm1660_vm3 = vcmask 57344  }
   0xa   :  { %1826 = vmatprep.subr.mxu0 %v2155_v4  ;;  %v172_v21 = vand.u32 4294901760, %v2241_v16  ;;  %v152_v22 = vsub.f32 %v150_v12, %v151_v17  ;;  %v159_v24 = vsub.f32 %v157_v14, %v158_v19  ;;  %v166_v25 = vsub.f32 %v2237_v15, %v165_v20  ;;  %v542_v53 = vld [vmem:[%s2740_s3 + $0x58] sm:$0xff]  ;;  %v541_v56 = vld [vmem:[%s2740_s3 + $0x50] sm:$0xff]  ;;  %v540_v60 = vld [vmem:[%s2740_s3 + $0x48] sm:$0xff] }
   0xb   :  { %1827 = vmatpush3.msra.mxu0 %v2216_v7  ;;  %v116_v23 = vand.u32 4294901760, %v2245_v18  ;;  %v2283_v37 = vand.u32 4294901760, %v545_v34  ;;  %v2289_v38 = vsub.f32 %v546_v33, %v2273_v35  ;;  %v2291_v39 = vand.u32 4294901760, %v544_v36  ;;  %v539_v1 = vld [vmem:[%s2740_s3 + $0x40] sm:$0xff]  ;;  %v538_v8 = vld [vmem:[%s2740_s3 + $0x38] sm:$0xff] }
   0xc   :  { %1828 = vmatprep.subr.mxu0 %v2155_v4  ;;  %v153_v26 = vand.u32 4294901760, %v152_v22  ;;  %v160_v28 = vand.u32 4294901760, %v159_v24  ;;  %v173_v29 = vsub.f32 %v2241_v16, %v172_v21  ;;  %v167_v31 = vand.u32 4294901760, %v166_v25 }
   0xd   :  { %1829 = vmatpush3.msra.mxu0 %v2225_v10  ;;  %v117_v27 = vsub.f32 %v2245_v18, %v116_v23  ;;  %v2297_v40 = vsub.f32 %v545_v34, %v2283_v37  ;;  %v648_v41 = vand.u32 4294901760, %v2289_v38  ;;  %v2306_v42 = vsub.f32 %v544_v36, %v2291_v39 }
   0xe   :  { %1844 = vmatprep.subr.mxu0 %v2155_v4  ;;  %1834 = vmatpush3.msra.mxu1 %v153_v26  ;;  %v174_v32 = vand.u32 4294901760, %v173_v29  ;;  %v2352_v52 = vand.u32 4294901760, %v543_v51  ;;  %v2360_v55 = vand.u32 4294901760, %v542_v53  ;;  %v2371_v59 = vand.u32 4294901760, %v541_v56  ;;  %v535_v26 = vld [vmem:[%s2740_s3 + $0x20] sm:$0xff] }
   0xf   :  { %v118_v30 = vand.u32 4294901760, %v117_v27  ;;  %1835 = vmatprep.subr.mxu1 %v2155_v4  ;;  %v655_v43 = vand.u32 4294901760, %v2297_v40  ;;  %v649_v44 = vsub.f32 %v2289_v38, %v648_v41  ;;  %v662_v45 = vand.u32 4294901760, %v2306_v42 }
  0x10   :  { %1836 = vmatpush3.msra.mxu1 %v160_v28  ;;  %v2358_v54 = vsub.f32 %v543_v51, %v2352_v52  ;;  %v2369_v58 = vsub.f32 %v542_v53, %v2360_v55  ;;  %v2383_v63 = vsub.f32 %v541_v56, %v2371_v59  ;;  %v2385_v0 = vand.u32 4294901760, %v540_v60  ;;  %v532_v56 = vld [vmem:[%s2740_s3 + $0x8] sm:$0xff] }
  0x11   :  { %1831 = vmatmul.mubr.f32.vlgmr.msra.gmra.mxu0 %v118_v30  ;;  %1837 = vmatprep.subr.mxu1 %v2155_v4  ;;  %v656_v46 = vsub.f32 %v2297_v40, %v655_v43  ;;  %v650_v47 = vand.u32 4294901760, %v649_v44  ;;  %v663_v48 = vsub.f32 %v2306_v42, %v662_v45  ;;  %v2457_v30 = vand.u32 4294901760, %v535_v26 }
  0x12   :  { %1845 = vmatpush3.msra.mxu0 %v150_v12  ;;  %1838 = vmatpush3.msra.mxu1 %v167_v31  ;;  %v669_v57 = vand.u32 4294901760, %v2358_v54  ;;  %v676_v62 = vand.u32 4294901760, %v2369_v58  ;;  %v2410_v12 = vand.u32 4294901760, %v538_v8 }
  0x13   :  { %1846 = vmatprep.subr.mxu0 %v2155_v4  ;;  %1839 = vmatprep.subr.mxu1 %v2155_v4  ;;  %v657_v49 = vand.u32 4294901760, %v656_v46  ;;  %v664_v50 = vand.u32 4294901760, %v663_v48  ;;  %v2470_v44 = vsub.f32 %v535_v26, %v2457_v30 }
  0x14   :  { %1847 = vmatpush3.msra.mxu0 %v157_v14  ;;  %1840 = vmatpush3.msra.mxu1 %v174_v32  ;;  %v670_v61 = vsub.f32 %v2358_v54, %v669_v57  ;;  %v677_v3 = vsub.f32 %v2369_v58, %v676_v62  ;;  %v537_v14 = vld [vmem:[%s2740_s3 + $0x30] sm:$0xff]  ;;  %v534_v32 = vld [vmem:[%s2740_s3 + $0x18] sm:$0xff] }
  0x15   :  { %1848 = vmatprep.subr.mxu0 %v2155_v4  ;;  %1842 = vmatmul.mubr.f32.vlgmr.msra.gmra.mxu1 %v2233_v13  ;;  %v2473_v46 = vand.u32 4294901760, %v534_v32 }
  0x16   :  { %1849 = vmatpush3.msra.mxu0 %v2237_v15  ;;  %1855 = vmatprep.subr.mxu1 %v2155_v4  ;;  %v671_v2 = vand.u32 4294901760, %v670_v61  ;;  %v678_v9 = vand.u32 4294901760, %v677_v3 }
  0x17   :  { %1850 = vmatprep.subr.mxu0 %v2155_v4  ;;  %1856 = vmatpush3.msra.mxu1 %v2212_v5  ;;  %v2488_v53 = vsub.f32 %v534_v32, %v2473_v46 }
  0x18   :  { %1851 = vmatpush3.msra.mxu0 %v2241_v16  ;;  %1852 = vmatprep.mubr.msk.f32.mxu0 %vm2156_vm1, %v2155_v4 }
  0x19   :  { %1857 = vmatprep.subr.mxu1 %v2155_v4  ;;  %1866 = vmatprep.subr.mxu0 %v2155_v4  ;;  %v2748_v3 = vand.u32 4294901760, %v2488_v53 }
  0x1a   :  { %1853 = vmatmul.mubr.f32.vlgmr.msra.gmra.mxu0 %v2245_v18  ;;  %1858 = vmatpush3.msra.mxu1 %v2214_v6  ;;  %v2426_v18 = vand.u32 4294901760, %v537_v14 }
  0x1b   :  { %1867 = vmatpush3.msra.mxu0 %v151_v17  ;;  %1859 = vmatprep.subr.mxu1 %v2155_v4  ;;  %v2424_v17 = vsub.f32 %v538_v8, %v2410_v12  ;;  %v531_v8 = vld [vmem:[%s2740_s3] sm:$0xff] }
  0x1c   :  { %1868 = vmatprep.subr.mxu0 %v2155_v4  ;;  %1860 = vmatpush3.msra.mxu1 %v2216_v7 }
  0x1d   :  { %1869 = vmatpush3.msra.mxu0 %v158_v19  ;;  %1861 = vmatprep.subr.mxu1 %v2155_v4  ;;  %v704_v22 = vand.u32 4294901760, %v2424_v17 }
  0x1e   :  { %1870 = vmatprep.subr.mxu0 %v2155_v4  ;;  %1862 = vmatpush3.msra.mxu1 %v2225_v10 }
  0x1f   :  { %1863 = vmatprep.mubr.msk.f32.mxu1 %vm2156_vm1, %v2155_v4  ;;  %1871 = vmatpush3.msra.mxu0 %v165_v20  ;;  %v536_v20 = vld [vmem:[%s2740_s3 + $0x28] sm:$0xff]  ;;  %v705_v27 = vsub.f32 %v2424_v17, %v704_v22 }
  0x20   :  { %1864 = vmatmul.mubr.f32.vlgmr.msra.gmra.mxu1 %v116_v23  ;;  %1872 = vmatprep.subr.mxu0 %v2155_v4  ;;  %v2437_v23 = vsub.f32 %v537_v14, %v2426_v18  ;;  %v2439_v24 = vand.u32 4294901760, %v536_v20 }
  0x21   :  { %1877 = vmatprep.subr.mxu1 %v2155_v4  ;;  %1873 = vmatpush3.msra.mxu0 %v172_v21  ;;  %v706_v33 = vand.u32 4294901760, %v705_v27 }
  0x22   :  { %1874 = vmatprep.mubr.msk.f32.mxu0 %vm2156_vm1, %v2155_v4  ;;  %1878 = vmatpush3.msra.mxu1 %v2212_v5  ;;  %v683_v5 = vand.u32 4294901760, %v2383_v63  ;;  %v711_v28 = vand.u32 4294901760, %v2437_v23  ;;  %v2455_v29 = vsub.f32 %v536_v20, %v2439_v24 }
  0x23   :  { %1875 = vmatmul.mubr.f32.vlgmr.msra.gmra.mxu0 %v2233_v13  ;;  %1879 = vmatprep.subr.mxu1 %v2155_v4 }
  0x24   :  { %1885 = vmatprep.mubr.msk.f32.mxu1 %vm2156_vm1, %v2155_v4  ;;  %1880 = vmatpush3.msra.mxu1 %v2214_v6  ;;  %v2397_v6 = vsub.f32 %v540_v60, %v2385_v0  ;;  %v712_v34 = vsub.f32 %v2437_v23, %v711_v28  ;;  %v2750_v36 = vand.u32 4294901760, %v2455_v29 }
  0x25   :  { %1888 = vmatprep.subr.mxu0 %v2155_v4  ;;  %1881 = vmatprep.subr.mxu1 %v2155_v4 }
  0x26   :  { %1889 = vmatpush3.msra.mxu0 %v2273_v35  ;;  %1882 = vmatpush3.msra.mxu1 %v2216_v7  ;;  %v2400_v7 = vand.u32 4294901760, %v539_v1  ;;  %v690_v11 = vand.u32 4294901760, %v2397_v6  ;;  %v713_v48 = vand.u32 4294901760, %v712_v34 }
  0x27   :  { %1890 = vmatprep.subr.mxu0 %v2155_v4  ;;  %1883 = vmatprep.subr.mxu1 %v2155_v4 }
  0x28   :  { %1891 = vmatpush3.msra.mxu0 %v2283_v37  ;;  %1884 = vmatpush3.msra.mxu1 %v2225_v10  ;;  %v684_v10 = vsub.f32 %v2383_v63, %v683_v5  ;;  %v691_v16 = vsub.f32 %v2397_v6, %v690_v11 }
  0x29   :  { %1892 = vmatprep.subr.mxu0 %v2155_v4  ;;  %1886 = vmatmul.mubr.f32.vlgmr.msra.gmra.mxu1 %v2233_v13  ;;  %v2414_v13 = vsub.f32 %v539_v1, %v2400_v7 }
  0x2a   :  { %1923 = vmatprep.subr.mxu1 %v2155_v4  ;;  %1893 = vmatpush3.msra.mxu0 %v2291_v39  ;;  %v685_v15 = vand.u32 4294901760, %v684_v10  ;;  %v692_v21 = vand.u32 4294901760, %v691_v16  ;;  %v733_v16 = vsub.f32 %v2488_v53, %v2748_v3 }
  0x2b   :  { %1924 = vmatpush3.msra.mxu1 %v650_v47  ;;  %1894 = vmatprep.subr.mxu0 %v2155_v4  ;;  %v697_v19 = vand.u32 4294901760, %v2414_v13  ;;  %v533_v47 = vld [vmem:[%s2740_s3 + $0x10] sm:$0xff] }
  0x2c   :  { %1925 = vmatprep.subr.mxu1 %v2155_v4  ;;  %1955 = vmatprep.mubr.msk.f32.mxu1 %vm2156_vm1, %v2155_v4  ;;  %v2484_v51 = vand.u32 4294901760, %v533_v47  ;;  %v734_v26 = vand.u32 4294901760, %v733_v16 }
  0x2d   :  { %1926 = vmatpush3.msra.mxu1 %v657_v49  ;;  %1920 = vmatprep.mubr.msk.f32.mxu0 %vm2156_vm1, %v2155_v4  ;;  %v698_v25 = vsub.f32 %v2414_v13, %v697_v19  ;;  %v719_v49 = vsub.f32 %v2455_v29, %v2750_v36 }
  0x2e   :  { %1927 = vmatprep.subr.mxu1 %v2155_v4  ;;  %1895 = vmatpush3.msra.mxu0 %v2352_v52  ;;  %v2499_v1 = vsub.f32 %v533_v47, %v2484_v51 }
  0x2f   :  { %1928 = vmatpush3.msra.mxu1 %v664_v50  ;;  %1896 = vmatprep.subr.mxu0 %v2155_v4  ;;  %v699_v31 = vand.u32 4294901760, %v698_v25  ;;  %v2749_v50 = vand.u32 4294901760, %v2470_v44  ;;  %v720_v60 = vand.u32 4294901760, %v719_v49 }
  0x30   :  { %1929 = vmatprep.subr.mxu1 %v2155_v4  ;;  %1897 = vmatpush3.msra.mxu0 %v2360_v55  ;;  %v2747_v10 = vand.u32 4294901760, %v2499_v1 }
  0x31   :  { %1898 = vmatprep.subr.mxu0 %v2155_v4  ;;  %1930 = vmatpush3.msra.mxu1 %v671_v2  ;;  %v726_v61 = vsub.f32 %v2470_v44, %v2749_v50  ;;  %v2501_v2 = vand.u32 4294901760, %v532_v56 }
  0x32   :  { %1899 = vmatpush3.msra.mxu0 %v2371_v59  ;;  %1931 = vmatprep.subr.mxu1 %v2155_v4  ;;  %v740_v20 = vsub.f32 %v2499_v1, %v2747_v10 }
  0x33   :  { %1900 = vmatprep.subr.mxu0 %v2155_v4  ;;  %1932 = vmatpush3.msra.mxu1 %v678_v9  ;;  %v727_v9 = vand.u32 4294901760, %v726_v61  ;;  %v2512_v14 = vsub.f32 %v532_v56, %v2501_v2 }
  0x34   :  { %1901 = vmatpush3.msra.mxu0 %v2385_v0  ;;  %1933 = vmatprep.subr.mxu1 %v2155_v4  ;;  %v741_v27 = vand.u32 4294901760, %v740_v20 }
  0x35   :  { %1902 = vmatprep.subr.mxu0 %v2155_v4  ;;  %1934 = vmatpush3.msra.mxu1 %v685_v15  ;;  %v2514_v15 = vand.u32 4294901760, %v531_v8 }
  0x36   :  { %1903 = vmatpush3.msra.mxu0 %v2400_v7  ;;  %1935 = vmatprep.subr.mxu1 %v2155_v4 }
  0x37   :  { %1904 = vmatprep.subr.mxu0 %v2155_v4  ;;  %1936 = vmatpush3.msra.mxu1 %v692_v21  ;;  %v2746_v21 = vand.u32 4294901760, %v2512_v14  ;;  %v2527_v25 = vsub.f32 %v531_v8, %v2514_v15 }
  0x38   :  { %1905 = vmatpush3.msra.mxu0 %v2410_v12  ;;  %1937 = vmatprep.subr.mxu1 %v2155_v4 }
  0x39   :  { %1906 = vmatprep.subr.mxu0 %v2155_v4  ;;  %1938 = vmatpush3.msra.mxu1 %v699_v31  ;;  %v747_v31 = vsub.f32 %v2512_v14, %v2746_v21  ;;  %v2745_v32 = vand.u32 4294901760, %v2527_v25 }
  0x3a   :  { %1907 = vmatpush3.msra.mxu0 %v2426_v18  ;;  %1939 = vmatprep.subr.mxu1 %v2155_v4 }
  0x3b   :  { %1908 = vmatprep.subr.mxu0 %v2155_v4  ;;  %1940 = vmatpush3.msra.mxu1 %v706_v33  ;;  %v748_v33 = vand.u32 4294901760, %v747_v31  ;;  %v754_v34 = vsub.f32 %v2527_v25, %v2745_v32 }
  0x3c   :  { %1909 = vmatpush3.msra.mxu0 %v2439_v24  ;;  %1941 = vmatprep.subr.mxu1 %v2155_v4 }
  0x3d   :  { %1910 = vmatprep.subr.mxu0 %v2155_v4  ;;  %1942 = vmatpush3.msra.mxu1 %v713_v48  ;;  %v755_v47 = vand.u32 4294901760, %v754_v34 }
  0x3e   :  { %1911 = vmatpush3.msra.mxu0 %v2457_v30  ;;  %1943 = vmatprep.subr.mxu1 %v2155_v4 }
  0x3f   :  { %1912 = vmatprep.subr.mxu0 %v2155_v4  ;;  %1944 = vmatpush3.msra.mxu1 %v720_v60  ;;  %v1676_v60 = vld [vmem:[%s2739_s2] ss:$0 sm:$0xff] }
  0x40   :  { %1913 = vmatpush3.msra.mxu0 %v2473_v46  ;;  %1945 = vmatprep.subr.mxu1 %v2155_v4 }
  0x41   :  { %1914 = vmatprep.subr.mxu0 %v2155_v4  ;;  %1946 = vmatpush3.msra.mxu1 %v727_v9 }
  0x42   :  { %1915 = vmatpush3.msra.mxu0 %v2484_v51  ;;  %1947 = vmatprep.subr.mxu1 %v2155_v4 }
  0x43   :  { %1916 = vmatprep.subr.mxu0 %v2155_v4  ;;  %1948 = vmatpush3.msra.mxu1 %v734_v26 }
  0x44   :  { %1917 = vmatpush3.msra.mxu0 %v2501_v2  ;;  %1949 = vmatprep.subr.mxu1 %v2155_v4 }
  0x45   :  { %1918 = vmatprep.subr.mxu0 %v2155_v4  ;;  %1950 = vmatpush3.msra.mxu1 %v741_v27 }
  0x46   :  { %1919 = vmatpush3.msra.mxu0 %v2514_v15  ;;  %1951 = vmatprep.subr.mxu1 %v2155_v4 }
  0x47   :  { %1958 = vmatprep.subr.mxu0 %v2155_v4  ;;  %1952 = vmatpush3.msra.mxu1 %v748_v33 }
  0x48   :  { %1953 = vmatprep.subr.mxu1 %v2155_v4 }
  0x49   :  { %1954 = vmatpush3.msra.mxu1 %v755_v47 }
  0x4a   :  { %1993 = vmatprep.subr.mxu1 %v2155_v4 }
  0xd1   :  { %v120_v48 = vpop.f32.mrf.mxu0 }
  0xd2   :  { %v121_v9 = vadd.f32 %v1676_v60, %v120_v48 }
  0xd3   :  { %v1832_v49 = vpop.f32.mrf.mxu0 }
  0xd5   :  { %v211_v56 = vpop.f32.mrf.mxu1 }
  0xd6   :  { %v212_v20 = vadd.f32 %v211_v56, %v121_v9 }
  0xd7   :  { %v1843_v61 = vpop.f32.mrf.mxu1 }
  0xda   :  { %v291_v8 = vpop.f32.mrf.mxu0 }
  0xdb   :  { %v292_v31 = vadd.f32 %v291_v8, %v212_v20 }
  0xdc   :  { %v1854_v16 = vpop.f32.mrf.mxu0 }
  0xe0   :  { %v368_v26 = vpop.f32.mrf.mxu1 }
  0xe1   :  { %v369_v34 = vadd.f32 %v368_v26, %v292_v31 }
  0xe2   :  { %v1865_v27 = vpop.f32.mrf.mxu1 }
  0xe3   :  { %v451_v33 = vpop.f32.mrf.mxu0 }
  0xe4   :  { %v452_v32 = vadd.f32 %v451_v33, %v369_v34 }
  0xe5   :  { %v1876_v47 = vpop.f32.mrf.mxu0 }
  0xe9   :  { %v526_v21 = vpop.f32.mrf.mxu1 }
  0xea   :  { %v527_v10 = vadd.f32 %v526_v21, %v452_v32 }
  0xeb   :  { %v1887_v49 = vpop.f32.mrf.mxu1 }
  0xec   :  { %v530_v3 = vmax.f32 %v527_v10, 0.0 }
  0xee   :  { %v2547_v50 = vand.u32 4294901760, %v530_v3 }
  0xf0   :  { %v2550_v36 = vsub.f32 %v530_v3, %v2547_v50  ;;  %1956 = vmatmul.mubr.f32.vlgmr.msra.gmra.mxu1 %v2547_v50 }
  0xf1   :  { %1994 = vmatpush3.msra.mxu1 %v2273_v35  ;;  %2025 = vmatprep.mubr.msk.f32.mxu1 %vm2156_vm1, %v2155_v4 }
  0xf2   :  { %v637_v48 = vand.u32 4294901760, %v2550_v36  ;;  %1995 = vmatprep.subr.mxu1 %v2155_v4 }
  0xf3   :  { %1996 = vmatpush3.msra.mxu1 %v2283_v37 }
  0xf4   :  { %v638_v10 = vsub.f32 %v2550_v36, %v637_v48  ;;  %1997 = vmatprep.subr.mxu1 %v2155_v4 }
  0xf5   :  { %1998 = vmatpush3.msra.mxu1 %v2291_v39 }
  0xf6   :  { %1999 = vmatprep.subr.mxu1 %v2155_v4  ;;  %v639_v3 = vand.u32 4294901760, %v638_v10 }
  0xf7   :  { %2000 = vmatpush3.msra.mxu1 %v2352_v52 }
  0xf8   :  { %2001 = vmatprep.subr.mxu1 %v2155_v4  ;;  %1921 = vmatmul.mubr.f32.vlgmr.msra.gmra.mxu0 %v639_v3 }
  0xf9   :  { %1959 = vmatpush3.msra.mxu0 %v2289_v38  ;;  %2002 = vmatpush3.msra.mxu1 %v2360_v55  ;;  %v2753_v38 = vand.u32 4294901760, %v2488_v53 }
  0xfa   :  { %1960 = vmatprep.subr.mxu0 %v2155_v4  ;;  %2003 = vmatprep.subr.mxu1 %v2155_v4 }
  0xfb   :  { %1961 = vmatpush3.msra.mxu0 %v2297_v40  ;;  %2004 = vmatpush3.msra.mxu1 %v2371_v59  ;;  %v2755_v40 = vand.u32 4294901760, %v2512_v14 }
  0xfc   :  { %1962 = vmatprep.subr.mxu0 %v2155_v4  ;;  %2005 = vmatprep.subr.mxu1 %v2155_v4 }
  0xfd   :  { %1963 = vmatpush3.msra.mxu0 %v2306_v42  ;;  %2006 = vmatpush3.msra.mxu1 %v2385_v0  ;;  %v1197_v42 = vld [vmem:[#allocation2] sm:$0x1] }
  0xfe   :  { %1964 = vmatprep.subr.mxu0 %v2155_v4  ;;  %2007 = vmatprep.subr.mxu1 %v2155_v4 }
  0xff   :  { %1965 = vmatpush3.msra.mxu0 %v2358_v54  ;;  %2008 = vmatpush3.msra.mxu1 %v2400_v7 }
 0x100   :  { %1966 = vmatprep.subr.mxu0 %v2155_v4  ;;  %2009 = vmatprep.subr.mxu1 %v2155_v4 }
 0x101   :  { %1967 = vmatpush3.msra.mxu0 %v2369_v58  ;;  %2010 = vmatpush3.msra.mxu1 %v2410_v12 }
 0x102   :  { %1968 = vmatprep.subr.mxu0 %v2155_v4  ;;  %2011 = vmatprep.subr.mxu1 %v2155_v4 }
 0x103   :  { %1969 = vmatpush3.msra.mxu0 %v2383_v63  ;;  %2012 = vmatpush3.msra.mxu1 %v2426_v18  ;;  %v1677_v63 = vld [vmem:[%s2741_s4] ss:$0 sm:$0xff]  ;;  %s2158_s4 = smov [#allocation3]  }
 0x104   :  { %1970 = vmatprep.subr.mxu0 %v2155_v4  ;;  %2013 = vmatprep.subr.mxu1 %v2155_v4 }
 0x105   :  { %1971 = vmatpush3.msra.mxu0 %v2397_v6  ;;  %2014 = vmatpush3.msra.mxu1 %v2439_v24 }
 0x106   :  { %1972 = vmatprep.subr.mxu0 %v2155_v4  ;;  %2015 = vmatprep.subr.mxu1 %v2155_v4 }
 0x107   :  { %1973 = vmatpush3.msra.mxu0 %v2414_v13  ;;  %2016 = vmatpush3.msra.mxu1 %v2457_v30 }
 0x108   :  { %1974 = vmatprep.subr.mxu0 %v2155_v4  ;;  %2017 = vmatprep.subr.mxu1 %v2155_v4 }
 0x109   :  { %1975 = vmatpush3.msra.mxu0 %v2424_v17  ;;  %2018 = vmatpush3.msra.mxu1 %v2473_v46 }
 0x10a   :  { %1976 = vmatprep.subr.mxu0 %v2155_v4  ;;  %2019 = vmatprep.subr.mxu1 %v2155_v4 }
 0x10b   :  { %1977 = vmatpush3.msra.mxu0 %v2437_v23  ;;  %2020 = vmatpush3.msra.mxu1 %v2484_v51 }
 0x10c   :  { %1978 = vmatprep.subr.mxu0 %v2155_v4  ;;  %2021 = vmatprep.subr.mxu1 %v2155_v4 }
 0x10d   :  { %1979 = vmatpush3.msra.mxu0 %v2455_v29  ;;  %2022 = vmatpush3.msra.mxu1 %v2501_v2 }
 0x10e   :  { %1980 = vmatprep.subr.mxu0 %v2155_v4  ;;  %2023 = vmatprep.subr.mxu1 %v2155_v4 }
 0x10f   :  { %1981 = vmatpush3.msra.mxu0 %v2470_v44  ;;  %2024 = vmatpush3.msra.mxu1 %v2514_v15 }
 0x110   :  { %1982 = vmatprep.subr.mxu0 %v2155_v4  ;;  %2026 = vmatmul.mubr.f32.vlgmr.msra.gmra.mxu1 %v637_v48 }
 0x111   :  { %2063 = vmatprep.subr.mxu1 %v2155_v4  ;;  %1983 = vmatpush3.msra.mxu0 %v2488_v53 }
 0x112   :  { %2064 = vmatpush3.msra.mxu1 %v2273_v35  ;;  %1984 = vmatprep.subr.mxu0 %v2155_v4  ;;  %v2751_v35 = vand.u32 4294901760, %v2455_v29 }
 0x113   :  { %2065 = vmatprep.subr.mxu1 %v2155_v4  ;;  %1985 = vmatpush3.msra.mxu0 %v2499_v1 }
 0x114   :  { %2066 = vmatpush3.msra.mxu1 %v2283_v37  ;;  %1986 = vmatprep.subr.mxu0 %v2155_v4  ;;  %v2752_v37 = vand.u32 4294901760, %v2470_v44 }
 0x115   :  { %2067 = vmatprep.subr.mxu1 %v2155_v4  ;;  %1987 = vmatpush3.msra.mxu0 %v2512_v14  ;;  %v1203_v14 = vlaneseq }
 0x116   :  { %2068 = vmatpush3.msra.mxu1 %v2291_v39  ;;  %1988 = vmatprep.subr.mxu0 %v2155_v4  ;;  %v2754_v39 = vand.u32 4294901760, %v2499_v1 }
 0x117   :  { %2069 = vmatprep.subr.mxu1 %v2155_v4  ;;  %1989 = vmatpush3.msra.mxu0 %v2527_v25 }
 0x118   :  { %1990 = vmatprep.mubr.msk.f32.mxu0 %vm2156_vm1, %v2155_v4  ;;  %2070 = vmatpush3.msra.mxu1 %v2352_v52 }
 0x119   :  { %1991 = vmatmul.mubr.f32.vlgmr.msra.gmra.mxu0 %v2550_v36  ;;  %2028 = vmatprep.subr.mxu0 %v2155_v4 }
 0x11a   :  { %2071 = vmatprep.subr.mxu1 %v2155_v4  ;;  %2029 = vmatpush3.msra.mxu0 %v648_v41  ;;  %v2756_v41 = vand.u32 4294901760, %v2527_v25 }
 0x11b   :  { %2072 = vmatpush3.msra.mxu1 %v2360_v55  ;;  %2030 = vmatprep.subr.mxu0 %v2155_v4 }
 0x11c   :  { %2073 = vmatprep.subr.mxu1 %v2155_v4  ;;  %2031 = vmatpush3.msra.mxu0 %v655_v43  ;;  %v2157_v43 = vmov 0  }
 0x11d   :  { %2074 = vmatpush3.msra.mxu1 %v2371_v59  ;;  %2032 = vmatprep.subr.mxu0 %v2155_v4 }
 0x11e   :  { %2075 = vmatprep.subr.mxu1 %v2155_v4  ;;  %2033 = vmatpush3.msra.mxu0 %v662_v45 }
 0x11f   :  { %2076 = vmatpush3.msra.mxu1 %v2385_v0  ;;  %2034 = vmatprep.subr.mxu0 %v2155_v4  ;;  %v1196_v0 = vld [vmem:[%s2742_s5] sm:$0x1]  ;;  %s1668_s5 = sshll.u32 %s2158_s4, 4  ;;  %s1669_s5 = int_to_ptr.vmem [resolvable:$true] %s1668_s5 }
 0x120   :  { %2077 = vmatprep.subr.mxu1 %v2155_v4  ;;  %2035 = vmatpush3.msra.mxu0 %v669_v57  ;;  %v1209_v6 = vsel %vm1207_vm2, %v1196_v0, 0  ;;  %s2133_s20 = scalar_lea.vmem %s1669_s5, 16  ;;  %s2137_s21 = scalar_lea.vmem %s1669_s5, 32 }
 0x121   :  { %2078 = vmatpush3.msra.mxu1 %v2400_v7  ;;  %2036 = vmatprep.subr.mxu0 %v2155_v4  ;;  %p2134_p0 = scmp.ne.s32.totalorder %s1669_s5, %s2133_s20  ;;  %p2138_p1 = scmp.lt.s32.totalorder %s1669_s5, %s1669_s5 }
 0x122   :  { %2079 = vmatprep.subr.mxu1 %v2155_v4  ;;  %2037 = vmatpush3.msra.mxu0 %v676_v62  ;;  %p2139_p2 = scmp.lt.s32.totalorder %s2137_s21, %s2133_s20 }
 0x123   :  { %2080 = vmatpush3.msra.mxu1 %v2410_v12  ;;  %2038 = vmatprep.subr.mxu0 %v2155_v4  ;;  %v1280_v12 = vand.u32 4294901760, %v1209_v6 }
 0x124   :  { %2081 = vmatprep.subr.mxu1 %v2155_v4  ;;  %2039 = vmatpush3.msra.mxu0 %v683_v5  ;;  %p2140_p3 = por %p2139_p2, %p2138_p1 }
 0x125   :  { %2082 = vmatpush3.msra.mxu1 %v2426_v18  ;;  %2040 = vmatprep.subr.mxu0 %v2155_v4  ;;  %v1281_v18 = vsub.f32 %v1209_v6, %v1280_v12 }
 0x126   :  { %2083 = vmatprep.subr.mxu1 %v2155_v4  ;;  %2041 = vmatpush3.msra.mxu0 %v690_v11  ;;  %p2141_p4 = pnand %p2140_p3, %p2134_p0 }
 0x127   :  { %2084 = vmatpush3.msra.mxu1 %v2439_v24  ;;  %2042 = vmatprep.subr.mxu0 %v2155_v4  ;;  %v1282_v24 = vand.u32 4294901760, %v1281_v18 }
 0x128   :  { %2085 = vmatprep.subr.mxu1 %v2155_v4  ;;  %2043 = vmatpush3.msra.mxu0 %v697_v19 }
 0x129   :  { %2086 = vmatpush3.msra.mxu1 %v2457_v30  ;;  %2044 = vmatprep.subr.mxu0 %v2155_v4  ;;  %v1283_v36 = vsub.f32 %v1281_v18, %v1282_v24 }
 0x12a   :  { %2087 = vmatprep.subr.mxu1 %v2155_v4  ;;  %2045 = vmatpush3.msra.mxu0 %v704_v22 }
 0x12b   :  { %2088 = vmatpush3.msra.mxu1 %v2473_v46  ;;  %2046 = vmatprep.subr.mxu0 %v2155_v4 }
 0x12c   :  { %2089 = vmatprep.subr.mxu1 %v2155_v4  ;;  %2047 = vmatpush3.msra.mxu0 %v711_v28 }
 0x12d   :  { %2090 = vmatpush3.msra.mxu1 %v2484_v51  ;;  %2048 = vmatprep.subr.mxu0 %v2155_v4 }
 0x12e   :  { %2091 = vmatprep.subr.mxu1 %v2155_v4  ;;  %2049 = vmatpush3.msra.mxu0 %v2751_v35 }
 0x12f   :  { %2092 = vmatpush3.msra.mxu1 %v2501_v2  ;;  %2050 = vmatprep.subr.mxu0 %v2155_v4 }
 0x130   :  { %2093 = vmatprep.subr.mxu1 %v2155_v4  ;;  %2051 = vmatpush3.msra.mxu0 %v2752_v37 }
 0x131   :  { %2094 = vmatpush3.msra.mxu1 %v2514_v15  ;;  %2095 = vmatprep.mubr.msk.f32.mxu1 %vm2156_vm1, %v2155_v4  ;;  %v1204_v15 = vshrl.u32 %v1203_v14, 7 }
 0x132   :  { %2052 = vmatprep.subr.mxu0 %v2155_v4  ;;  %2096 = vmatmul.mubr.f32.vlgmr.msra.gmra.mxu1 %v2547_v50 }
 0x133   :  { %2053 = vmatpush3.msra.mxu0 %v2753_v38  ;;  %2060 = vmatprep.mubr.msk.f32.mxu0 %vm2156_vm1, %v2155_v4  ;;  %v1205_v21 = vsub.s32 0, %v1204_v15 }
 0x134   :  { %2054 = vmatprep.subr.mxu0 %v2155_v4  ;;  %2103 = vmatprep.subr.mxu1 %v2155_v4 }
 0x135   :  { %2055 = vmatpush3.msra.mxu0 %v2754_v39  ;;  %2105 = vmatprep.mubr.msk.f32.mxu1 %vm2156_vm1, %v2155_v4 }
 0x136   :  { %2056 = vmatprep.subr.mxu0 %v2155_v4  ;;  %2132 = vset.pattern.permute.xlu0 %v2157_v43 }
 0x137   :  { %2057 = vmatpush3.msra.mxu0 %v2755_v40  ;;  %1200 = vperm.xlu0 %2132, %v1197_v42  }
 0x138   :  { %2058 = vmatprep.subr.mxu0 %v2155_v4 }
 0x139   :  { %2059 = vmatpush3.msra.mxu0 %v2756_v41 }
 0x13a   :  { %2061 = vmatmul.mubr.f32.vlgmr.msra.gmra.mxu0 %v2547_v50  ;;  %2098 = vmatprep.subr.mxu0 %v2155_v4  ;;  %v1284_v50 = vand.u32 4294901760, %v1283_v36 }
 0x13b   :  { %2100 = vmatprep.mubr.msk.f32.mxu0 %vm2156_vm1, %v2155_v4 }
 0x1b0   :  { %v792_v45 = vpop.f32.mrf.mxu1 }
 0x1b2   :  { %v1957_v52 = vpop.f32.mrf.mxu1  ;;  %v1201_v25 = vpop.permute.xlu0 %1200 }
 0x1b3   :  { %v1206_v56 = vrot.slane %v1201_v25, %v1205_v21 }
 0x1b8   :  { %v641_v54 = vpop.f32.mrf.mxu0 }
 0x1b9   :  { %v642_v5 = vadd.f32 %v1677_v63, %v641_v54 }
 0x1ba   :  { %v1922_v55 = vpop.f32.mrf.mxu0 }
 0x1bb   :  { %v793_v11 = vadd.f32 %v792_v45, %v642_v5 }
 0x1d0   :  { %v985_v57 = vpop.f32.mrf.mxu1 }
 0x1d2   :  { %v2027_v58 = vpop.f32.mrf.mxu1 }
 0x1d9   :  { %v896_v59 = vpop.f32.mrf.mxu0 }
 0x1da   :  { %v897_v17 = vadd.f32 %v896_v59, %v793_v11 }
 0x1db   :  { %v1992_v62 = vpop.f32.mrf.mxu0 }
 0x1dc   :  { %v986_v19 = vadd.f32 %v985_v57, %v897_v17 }
 0x1f2   :  { %v1191_v7 = vpop.f32.mrf.mxu1 }
 0x1f4   :  { %v2097_v13 = vpop.f32.mrf.mxu1 }
 0x1fa   :  { %v1104_v22 = vpop.f32.mrf.mxu0 }
 0x1fb   :  { %v1105_v23 = vadd.f32 %v1104_v22, %v986_v19 }
 0x1fc   :  { %v2062_v28 = vpop.f32.mrf.mxu0 }
 0x1fd   :  { %v1192_v29 = vadd.f32 %v1191_v7, %v1105_v23 }
 0x1ff   :  { %v1195_v30 = vmax.f32 %v1192_v29, 0.0 }
 0x201   :  { %v1212_v44 = vsel %vm1207_vm2, %v1195_v30, 0 }
 0x202   :  { %v1245_v46 = vand.u32 4294901760, %v1212_v44 }
 0x204   :  { %v1322_v51 = vsub.f32 %v1212_v44, %v1245_v46  ;;  %2099 = vmatpush3.xpose.msra.mxu0 %v1245_v46 }
 0x205   :  { %2108 = vmatprep.subr.mxu0 %v2155_v4 }
 0x206   :  { %v1323_v53 = vand.u32 4294901760, %v1322_v51 }
 0x207   :  { %2101 = vmatmul.mubr.f32.vlgmr.msra.gmra.mxu0 %v1284_v50 }
 0x208   :  { %2109 = vmatpush3.xpose.msra.mxu0 %v1322_v51  ;;  %2110 = vmatprep.mubr.msk.f32.mxu0 %vm2156_vm1, %v2155_v4  ;;  %v1324_v1 = vsub.f32 %v1322_v51, %v1323_v53 }
 0x209   :  { %2118 = vmatprep.subr.mxu0 %v2155_v4 }
 0x20a   :  { %v1325_v2 = vand.u32 4294901760, %v1324_v1 }
 0x20b   :  { %2111 = vmatmul.mubr.f32.vlgmr.msra.gmra.mxu0 %v1281_v18 }
 0x20c   :  { %2104 = vmatpush3.xpose.msra.mxu1 %v1325_v2  ;;  %2119 = vmatpush3.xpose.msra.mxu0 %v1323_v53 }
 0x20d   :  { %2113 = vmatprep.subr.mxu1 %v2155_v4  ;;  %2120 = vmatprep.mubr.msk.f32.mxu0 %vm2156_vm1, %v2155_v4 }
 0x20f   :  { %2106 = vmatmul.mubr.f32.vlgmr.msra.gmra.mxu1 %v1280_v12  ;;  %2121 = vmatmul.mubr.f32.vlgmr.msra.gmra.mxu0 %v1280_v12 }
 0x210   :  { %2114 = vmatpush3.xpose.msra.mxu1 %v1245_v46  ;;  %2115 = vmatprep.mubr.msk.f32.mxu1 %vm2156_vm1, %v2155_v4 }
 0x211   :  { %2123 = vmatprep.subr.mxu1 %v2155_v4 }
 0x213   :  { %2116 = vmatmul.mubr.f32.vlgmr.msra.gmra.mxu1 %v1282_v24 }
 0x214   :  { %2124 = vmatpush3.xpose.msra.mxu1 %v1245_v46  ;;  %2125 = vmatprep.mubr.msk.f32.mxu1 %vm2156_vm1, %v2155_v4 }
 0x217   :  { %2126 = vmatmul.mubr.f32.vlgmr.msra.gmra.mxu1 %v1280_v12 }
 0x2c7   :  { %v1286_v32 = vpop.f32.mrf.mxu0 }
 0x2c8   :  { %v1287_v8 = vadd.f32 %v1286_v32, %v1206_v56 }
 0x2c9   :  { %v2102_v60 = vpop.f32.mrf.mxu0 }
 0x2cb   :  { %v1436_v61 = vpop.f32.mrf.mxu0 }
 0x2cd   :  { %v2112_v9 = vpop.f32.mrf.mxu0 }
 0x2cf   :  { %v1362_v16 = vpop.f32.mrf.mxu1  ;;  %v1584_v20 = vpop.f32.mrf.mxu0 }
 0x2d0   :  { %v1363_v26 = vadd.f32 %v1362_v16, %v1287_v8 }
 0x2d1   :  { %v2107_v27 = vpop.f32.mrf.mxu1  ;;  %v2122_v31 = vpop.f32.mrf.mxu0 }
 0x2d2   :  { %v1437_v33 = vadd.f32 %v1436_v61, %v1363_v26 }
 0x2d3   :  { %v1510_v34 = vpop.f32.mrf.mxu1 }
 0x2d4   :  { %v1511_v47 = vadd.f32 %v1510_v34, %v1437_v33 }
 0x2d5   :  { %v2117_v4 = vpop.f32.mrf.mxu1 }
 0x2d6   :  { %v1585_v49 = vadd.f32 %v1584_v20, %v1511_v47 }
 0x2d7   :  { %v1656_v48 = vpop.f32.mrf.mxu1 }
 0x2d8   :  { %v1657_v10 = vadd.f32 %v1656_v48, %v1585_v49 }
 0x2d9   :  { %v2127_v3 = vpop.f32.mrf.mxu1 }
 0x2da   :  { %1661 = vst.msk [vmem:[#allocation3] sm:$0x1] %vm1660_vm3, %v1657_v10 }
 0x2db   :  { %2144 = shalt.err (!%p2141_p4)
}
 0x2dc   :  { %1671 = dma.vmem_to_hbm [thread:$0]  %s1669_s5, 16, %s2744_s7, [#allocation4]  }
 0x2dd   :  { %2153 = dma.done.wait [#allocation4], 16  }
 0x2de   :  { %2154 = vsyncadd [#allocation4], 4294967280 }
 0x2df   :  { %1675 = vsyncpa [#allocation4], 1 }

</bundles_post_ra>
